<compile_context>
chip_gen: v7x
topology: tpu7x:2x2x1
jax: 0.10.0
libtpu: 0.0.40
codegen_flags: <defaults>
</compile_context>

<pallas_src>
import functools
from dataclasses import dataclass

import jax
import jax.numpy as jnp
from jax.experimental import pallas as pl
from jax.experimental.pallas import tpu as pltpu


@dataclass
class KVCache:
    k: jax.Array
    v: jax.Array


def _round_up(x, m):
    return (x + m - 1) // m * m


def _kv_fused_kernel(x_ref, w_ref, o_ref):
    # x_ref: (tm, in_dim)          row tile of flattened hidden states
    # w_ref: (in_dim, n_pad)       fused [Wk^T | Wv^T], lane-padded to 128
    # o_ref: (tm, n_pad)           fused [K | V] output tile
    o_ref[...] = jnp.dot(
        x_ref[...], w_ref[...], preferred_element_type=jnp.float32
    ).astype(o_ref.dtype)


@functools.partial(jax.jit, static_argnames=("tm",))
def _kv_copy_impl(hidden_states, wk_t, wv_t, *, tm=None):
    """hidden_states: (B, S, in_dim); wk_t/wv_t: (in_dim, inner_dim).
    Returns (k, v), each (B, S, inner_dim)."""
    B, S, in_dim = hidden_states.shape
    inner_dim = wk_t.shape[1]
    M = B * S

    if tm is None:
        # Big row tile (MXU has 128/256 systolic rows); shrink for tiny inputs
        # so we don't pad a handful of rows up to 512.
        tm = min(512, _round_up(M, 8))
    m_pad = _round_up(M, tm)

    n_total = 2 * inner_dim
    n_pad = _round_up(n_total, 128)          # lane-dense output stores

    # Flatten + pad rows; fuse + pad weights along the output (lane) dim.
    x2d = hidden_states.reshape(M, in_dim)
    if m_pad != M:
        x2d = jnp.pad(x2d, ((0, m_pad - M), (0, 0)))
    w_fused = jnp.concatenate([wk_t, wv_t], axis=1)
    if n_pad != n_total:
        w_fused = jnp.pad(w_fused, ((0, 0), (0, n_pad - n_total)))

    dtype_bytes = jnp.dtype(hidden_states.dtype).itemsize
    # x tile + out tile (double-buffered) + fused weight (double-buffered) + headroom.
    vmem_bytes = (
        2 * tm * in_dim * dtype_bytes
        + 2 * tm * n_pad * dtype_bytes
        + 2 * in_dim * n_pad * dtype_bytes
        + (2 << 20)
    )
    vmem_bytes = int(min(vmem_bytes, 64 << 20))   # stay within v7x per-TC VMEM

    cost = pl.CostEstimate(
        flops=2 * m_pad * in_dim * n_pad,
        transcendentals=0,
        bytes_accessed=dtype_bytes
        * (m_pad * in_dim + in_dim * n_pad + m_pad * n_pad),
    )

    out = pl.pallas_call(
        _kv_fused_kernel,
        out_shape=jax.ShapeDtypeStruct((m_pad, n_pad), hidden_states.dtype),
        grid_spec=pltpu.PrefetchScalarGridSpec(
            num_scalar_prefetch=0,
            grid=(m_pad // tm,),
            in_specs=[
                pl.BlockSpec((tm, in_dim), lambda i: (i, 0)),     # x row tile
                pl.BlockSpec((in_dim, n_pad), lambda i: (0, 0)),  # fused weight (resident)
            ],
            out_specs=pl.BlockSpec((tm, n_pad), lambda i: (i, 0)),
        ),
        compiler_params=pltpu.CompilerParams(
            dimension_semantics=("parallel",),
            vmem_limit_bytes=vmem_bytes,
        ),
        cost_estimate=cost,
    )(x2d, w_fused)

    kv = out[:M].reshape(B, S, n_pad)
    k = kv[..., :inner_dim]
    v = kv[..., inner_dim:n_total]
    return k, v


def kv_copy_forward(hidden_states, wk_t, wv_t, tm=None):
    k, v = _kv_copy_impl(hidden_states, wk_t, wv_t, tm=tm)
    return KVCache(k=k, v=v)


def init_kv_copy_params(key, inner_dim, cross_attention_dim=None,
                        dtype=jnp.float32):
    """Synthetic init matching PyTorch Linear weight shapes (inner_dim, in_dim);
    returned pre-transposed to (in_dim, inner_dim)."""
    in_dim = cross_attention_dim or inner_dim
    kk, kv = jax.random.split(key)
    bound = 1.0 / (in_dim ** 0.5)
    wk = jax.random.uniform(kk, (inner_dim, in_dim), dtype, -bound, bound)
    wv = jax.random.uniform(kv, (inner_dim, in_dim), dtype, -bound, bound)
    return wk.T, wv.T  # (in_dim, inner_dim)


if __name__ == "__main__":
    key = jax.random.PRNGKey(0)
    k_w, k_x = jax.random.split(key)

    batch, seq = 2, 8
    inner_dim = 32
    cross_attention_dim = 32  # in_dim

    wk_t, wv_t = init_kv_copy_params(k_w, inner_dim, cross_attention_dim)
    hidden_states = jax.random.normal(
        k_x, (batch, seq, cross_attention_dim), jnp.float32
    )

    cache = kv_copy_forward(hidden_states, wk_t, wv_t)
    jax.block_until_ready((cache.k, cache.v))

    # Reference check (plain JAX) against nn.Linear(bias=False) semantics.
    k_ref = hidden_states @ wk_t
    v_ref = hidden_states @ wv_t
    assert cache.k.shape == k_ref.shape and cache.v.shape == v_ref.shape
    assert jnp.allclose(cache.k, k_ref, atol=1e-5, rtol=1e-5)
    assert jnp.allclose(cache.v, v_ref, atol=1e-5, rtol=1e-5)

    print("KERNEL_OK")
</pallas_src>

<mosaic_0001>
module attributes {stable_mosaic.version = 11 : i64} {
  func.func @_kv_fused_kernel(%arg0: i32, %arg1: memref<16x32xf32, #tpu.memory_space<vmem>>, %arg2: memref<32x128xf32, #tpu.memory_space<vmem>>, %arg3: memref<16x128xf32, #tpu.memory_space<vmem>>) attributes {dimension_semantics = [#tpu.dimension_semantics<parallel>], iteration_bounds = array<i64: 1>, scalar_prefetch = 0 : i64, scratch_operands = 0 : i64, tpu.core_type = #tpu.core_type<tc>, window_params = [{transform_indices = @transform_0, window_bounds = array<i64: 16, 32>}, {pipeline_mode = #tpu.pipeline_mode<synchronous>, transform_indices = @transform_1, window_bounds = array<i64: 32, 128>}, {transform_indices = @transform_2, window_bounds = array<i64: 16, 128>}]} {
    %c0 = arith.constant 0 : index
    %c0_0 = arith.constant 0 : index
    %0 = vector.load %arg1[%c0, %c0_0] : memref<16x32xf32, #tpu.memory_space<vmem>>, vector<16x32xf32>
    %c0_1 = arith.constant 0 : index
    %c0_2 = arith.constant 0 : index
    %1 = vector.load %arg2[%c0_1, %c0_2] : memref<32x128xf32, #tpu.memory_space<vmem>>, vector<32x128xf32>
    %cst = arith.constant dense<0.000000e+00> : vector<16x128xf32>
    %2 = tpu.matmul %0, %1, %cst {dimension_numbers = #tpu.dot_dimension_numbers<[1], [0], [0], [1], [0, 0, 1, 1], [], []>} : vector<16x32xf32>, vector<32x128xf32>, vector<16x128xf32> -> vector<16x128xf32>
    %c0_3 = arith.constant 0 : index
    %c0_4 = arith.constant 0 : index
    %3 = vector.load %arg3[%c0_3, %c0_4] : memref<16x128xf32, #tpu.memory_space<vmem>>, vector<16x128xf32>
    tpu.vector_store %arg3[%c0_3, %c0_4], %2 {strides = array<i32>} : memref<16x128xf32, #tpu.memory_space<vmem>>, vector<16x128xf32>,
    return
  }
  func.func @transform_0(%arg0: i32) -> (i32, i32) {
    %c0_i32 = arith.constant 0 : i32
    %c0_i32_0 = arith.constant 0 : i32
    return %arg0, %c0_i32 : i32, i32
  }
  func.func @transform_1(%arg0: i32) -> (i32, i32) {
    %c0_i32 = arith.constant 0 : i32
    %c0_i32_0 = arith.constant 0 : i32
    %c0_i32_1 = arith.constant 0 : i32
    return %c0_i32, %c0_i32_0 : i32, i32
  }
  func.func @transform_2(%arg0: i32) -> (i32, i32) {
    %c0_i32 = arith.constant 0 : i32
    %c0_i32_0 = arith.constant 0 : i32
    return %arg0, %c0_i32 : i32, i32
  }
}

</mosaic_0001>

<bundles_post_ra>
// kernel: _kv_copy_impl.1
= control target key start
LH: loop header
LB: loop body
LE: loop exit
PB: predicated region body
PF: predicated region fallthrough
CT: control target
= control target key end

     0   :  { %vm17_vm0 = vcmask 261120   ;;  %s171_s1 = inlined_call_operand.vmem [shape: f32[32,128], index: 1, kind: input, shape index: {}]   ;;  %s172_s0 = inlined_call_operand.vmem [shape: f32[16,32], index: 0, kind: input, shape index: {}]   ;;  %s173_s2 = inlined_call_operand.vmem [shape: f32[16,128], index: 2, kind: output, shape index: {}]  }
   0x1   :  { %v13_v0 = vld [vmem:[%s171_s1] sm:$0xff]  ;;  %v14_v1 = vld [vmem:[%s171_s1 + $0x8] sm:$0xff]  ;;  %v15_v2 = vld [vmem:[%s171_s1 + $0x10] sm:$0xff] }
   0x2   :  { %v124_v3 = vpack.c.bf16 %v14_v1, %v13_v0  ;;  %v16_v4 = vld [vmem:[%s171_s1 + $0x18] sm:$0xff]  ;;  %v11_v5 = vld [vmem:[%s172_s0] sm:$0xff]  ;;  %v12_v7 = vld [vmem:[%s172_s0 + $0x8] sm:$0xff] }
   0x3   :  { %v128_v6 = vpack.c.bf16 %v16_v4, %v15_v2  ;;  %121 = vmatprep.mubr.msk.f32.mxu0 %vm17_vm0, %v11_v5 }
   0x4   :  { %125 = vmatprep.subr.bf16.mxu0 %v124_v3 }
   0x5   :  { %127 = vmatpush3.bf16.msra.mxu0 %v124_v3 }
   0x6   :  { %129 = vmatprep.subr.bf16.mxu0 %v128_v6 }
   0x9   :  { %131 = vmatpush3.bf16.msra.mxu0 %v128_v6 }
   0xc   :  { %122 = vmatmul.mubr.msk.f32.vlgmr.msra.gmra.mrb[0].mxu0 %vm17_vm0, %v12_v7 }
  0xdf   :  { %v123_v8 = vpop.f32.mrb[0].mxu0 }
  0xe0   :  { %100 = vst [vmem:[%s173_s2 + $0x8] sm:$0xff] %v123_v8  ;;  %v90_v9 = vpop.f32.mrb[1].mxu0 }
  0xe1   :  { %99 = vst [vmem:[%s173_s2] sm:$0xff] %v90_v9 }

</bundles_post_ra>
